<compile_context>
chip_gen: v6e
topology: v6e:2x2x1
jax: 0.10.0
libtpu: 0.0.40
codegen_flags: <defaults>
</compile_context>

<pallas_src>
import functools

import jax
import jax.numpy as jnp
from jax import lax
from jax.experimental import pallas as pl
from jax.experimental.pallas import tpu as pltpu

_MIB = 1024 * 1024

# Optional (budget_bytes, vmem_limit_bytes) override; the self-test uses it to
# exercise the K-tiled / masked-tail code paths with tiny inputs.
_BUDGET_OVERRIDE = None

# Cap on the K tile when the bf16 MXU row-sum path is used (the (tk, 128) ones
# operand is lane-padded in VMEM, so keep it <= ~1 MiB).
_MXU_TK_CAP = 4096


# ----------------------------------------------------------------------------
# Tiling helpers
# ----------------------------------------------------------------------------

def _vmem_params():
    """(per-step working-set budget, scoped-VMEM limit), generation aware.

    v5e/v6e have 128 MiB physical VMEM -> bigger tiles; v7x has 64 MiB per
    TensorCore -> stay conservative so double-buffered tiles plus masked-tail
    temporaries never exceed the scoped limit.
    """
    if _BUDGET_OVERRIDE is not None:
        return _BUDGET_OVERRIDE
    try:
        cap = int(pltpu.get_tpu_info().vmem_capacity_bytes)
    except Exception:
        cap = 64 * _MIB
    if cap >= 96 * _MIB:            # v5e / v6e (128 MiB physical)
        return 24 * _MIB, 56 * _MIB
    return 18 * _MIB, 44 * _MIB     # v7x (64 MiB per TC) or unknown


def _round_up(x, m):
    return ((x + m - 1) // m) * m


def _sublane_quantum(dtype):
    # f32 -> 8, bf16/f16 -> 16, int8/fp8 -> 32 (packed sublane tiles)
    return max(8, 32 // jnp.dtype(dtype).itemsize)


def _pick_tile(n, quantum, cap):
    """Largest legal block extent for an array extent n, roughly <= cap.

    Full extent is always legal; otherwise the block extent must be a multiple
    of `quantum` (the (8,128)/packing constraint on the last two block dims).
    Never returns more than n.
    """
    cap = max(int(cap), 1)
    if n <= cap or n <= quantum:
        return n
    return max((cap // quantum) * quantum, quantum)


def _split_for_megacore(n, tile, quantum):
    """If a 'parallel' axis currently has a single grid step, halve the tile so
    both v7x TensorCores get work.  Costs one extra (pipelined) grid step on
    single-core chips -- negligible."""
    if tile >= n and n > quantum:
        return max(_round_up(pl.cdiv(n, 2), quantum), quantum)
    return tile


# ----------------------------------------------------------------------------
# Case B: reduction axis is the minor (last) axis -> (M, K) row mean
# ----------------------------------------------------------------------------

def _mean_last_kernel(x_ref, o_ref, acc_ref, *, inv_k, tk, k_total, mask_k,
                      use_mxu):
    """(tm, tk) block of an (M, K) array; mean over K (lanes).

    acc_ref is a (tm, 128) f32 scratch (same VMEM footprint as (tm, 1) after
    lane padding); every lane carries the same running row sum, column 0 is
    written out at the last K step.
    """
    k = pl.program_id(1)
    last = pl.num_programs(1) - 1

    @pl.when(k == 0)
    def _():
        acc_ref[...] = jnp.zeros_like(acc_ref)

    def accumulate(x):
        if use_mxu:
            # Row sum on the otherwise-idle MXU: x @ ones.  bf16 feeds the MXU
            # directly -> no bf16->f32 VPU converts in the steady state.
            ones = jnp.ones((x.shape[1], 128), x.dtype)
            acc_ref[...] += jnp.dot(x, ones, preferred_element_type=jnp.float32)
        else:
            if x.dtype != jnp.float32:
                x = x.astype(jnp.float32)
            acc_ref[...] += jnp.sum(x, axis=1, keepdims=True)

    if mask_k:
        # Ragged K: steady-state path stays mask-free; only the final K step
        # pays for iota/compare/select (1-row iota keeps temporaries small).
        @pl.when(k < last)
        def _():
            accumulate(x_ref[...])

        @pl.when(k == last)
        def _():
            x = x_ref[...]
            col = lax.broadcasted_iota(jnp.int32, (1, x.shape[1]), 1) + k * tk
            accumulate(jnp.where(col < k_total, x, jnp.zeros_like(x)))
    else:
        accumulate(x_ref[...])

    @pl.when(k == last)
    def _():
        o_ref[...] = (acc_ref[...][:, :1] * inv_k).astype(o_ref.dtype)


def _mean_last_axis(x2d):
    """(M, K) -> (M, 1) row-wise mean; K lane-dense, K-tiled f32 accumulation."""
    M, K = x2d.shape
    itemsize = jnp.dtype(x2d.dtype).itemsize
    sub_q = _sublane_quantum(x2d.dtype)
    budget, vmem_limit = _vmem_params()
    use_mxu = x2d.dtype == jnp.bfloat16

    lane_k = _round_up(K, 128)                       # VMEM lane padding of K
    out_row = 2 * 128 * itemsize + 128 * 4           # out double-buf + f32 acc / row
    row_full = 2 * lane_k * itemsize + out_row       # bytes per row at tk == K
    rows_full = budget // row_full

    if (not use_mxu or K <= _MXU_TK_CAP) and rows_full >= min(M, sub_q):
        # Whole K per block: single K step, no ragged masking at all.
        tk = K
        tm = _pick_tile(M, sub_q, rows_full)
        tm = _split_for_megacore(M, tm, sub_q)
    else:
        # K-tiled: bound the rows, then fill the remaining budget along K.
        tm = _pick_tile(M, sub_q, 1024)
        tm = _split_for_megacore(M, tm, sub_q)
        tk_cap = max((budget - tm * out_row) // (2 * tm * itemsize), 128)
        if use_mxu:
            tk_cap = min(tk_cap, _MXU_TK_CAP)
        tk = _pick_tile(K, 128, tk_cap)

    grid = (pl.cdiv(M, tm), pl.cdiv(K, tk))
    kernel = functools.partial(
        _mean_last_kernel, inv_k=1.0 / K, tk=tk, k_total=K,
        mask_k=(K % tk) != 0, use_mxu=use_mxu)
    cost = pl.CostEstimate(flops=M * K, transcendentals=0,
                           bytes_accessed=(M * K + M) * itemsize)

    return pl.pallas_call(
        kernel,
        out_shape=jax.ShapeDtypeStruct((M, 1), x2d.dtype),
        grid_spec=pltpu.PrefetchScalarGridSpec(
            num_scalar_prefetch=0,
            grid=grid,
            in_specs=[pl.BlockSpec((tm, tk), lambda i, k: (i, k))],
            out_specs=pl.BlockSpec((tm, 1), lambda i, k: (i, 0)),
            scratch_shapes=[pltpu.VMEM((tm, 128), jnp.float32)],
        ),
        compiler_params=pltpu.CompilerParams(
            dimension_semantics=("parallel", "arbitrary"),
            vmem_limit_bytes=vmem_limit,
        ),
        cost_estimate=cost,
    )(x2d)


# ----------------------------------------------------------------------------
# Case A: reduction axis is a middle axis -> (pre, K, post) mean over axis 1
# ----------------------------------------------------------------------------

def _mean_mid_kernel(x_ref, o_ref, acc_ref, *, inv_k, tk, k_total, mask_k):
    k = pl.program_id(2)
    last = pl.num_programs(2) - 1

    @pl.when(k == 0)
    def _():
        acc_ref[...] = jnp.zeros_like(acc_ref)

    def accumulate(x):
        if x.dtype != jnp.float32:
            x = x.astype(jnp.float32)
        acc_ref[...] += jnp.sum(x, axis=1)

    if mask_k:
        @pl.when(k < last)
        def _():
            accumulate(x_ref[...])

        @pl.when(k == last)
        def _():
            x = x_ref[...]
            row = lax.broadcasted_iota(jnp.int32, (1, x.shape[1], 1), 1) + k * tk
            accumulate(jnp.where(row < k_total, x, jnp.zeros_like(x)))
    else:
        accumulate(x_ref[...])

    @pl.when(k == last)
    def _():
        o_ref[...] = (acc_ref[...] * inv_k).astype(o_ref.dtype)


def _mean_middle_axis(x3d):
    """(pre, K, post) -> (pre, post) mean over axis 1.  Keeps the original minor
    axis on the lanes (no transpose / extra HBM pass), lane-dense output."""
    pre, K, post = x3d.shape
    itemsize = jnp.dtype(x3d.dtype).itemsize
    sub_q = _sublane_quantum(x3d.dtype)
    budget, vmem_limit = _vmem_params()

    tpost = _pick_tile(post, 128, 2048)              # lanes
    lane_post = _round_up(tpost, 128)

    # Size the K tile for a minimal pre tile, then grow the pre tile into the
    # remaining budget.
    tpre0 = min(pre, sub_q)
    out_bytes = (2 * itemsize + 4) * _round_up(tpre0, 8) * lane_post
    per_k = 2 * tpre0 * lane_post * itemsize         # input double buffer / K elem
    tk = _pick_tile(K, sub_q, max((budget - out_bytes) // per_k, sub_q))

    per_pre = (2 * _round_up(tk, sub_q) * itemsize + 2 * itemsize + 4) * lane_post
    tpre = _pick_tile(pre, sub_q, max(budget // per_pre, 1))

    # Megacore: make sure the kept ("parallel") axes have >= 2 grid steps.
    if pl.cdiv(pre, tpre) * pl.cdiv(post, tpost) == 1:
        new_tpre = _split_for_megacore(pre, tpre, sub_q)
        if new_tpre != tpre:
            tpre = new_tpre
        else:
            tpost = _split_for_megacore(post, tpost, 128)

    grid = (pl.cdiv(pre, tpre), pl.cdiv(post, tpost), pl.cdiv(K, tk))
    kernel = functools.partial(
        _mean_mid_kernel, inv_k=1.0 / K, tk=tk, k_total=K,
        mask_k=(K % tk) != 0)
    cost = pl.CostEstimate(flops=pre * K * post, transcendentals=0,
                           bytes_accessed=(pre * K * post + pre * post) * itemsize)

    return pl.pallas_call(
        kernel,
        out_shape=jax.ShapeDtypeStruct((pre, post), x3d.dtype),
        grid_spec=pltpu.PrefetchScalarGridSpec(
            num_scalar_prefetch=0,
            grid=grid,
            in_specs=[pl.BlockSpec((tpre, tk, tpost), lambda i, j, k: (i, k, j))],
            out_specs=pl.BlockSpec((tpre, tpost), lambda i, j, k: (i, j)),
            scratch_shapes=[pltpu.VMEM((tpre, tpost), jnp.float32)],
        ),
        compiler_params=pltpu.CompilerParams(
            dimension_semantics=("parallel", "parallel", "arbitrary"),
            vmem_limit_bytes=vmem_limit,
        ),
        cost_estimate=cost,
    )(x3d)


# ----------------------------------------------------------------------------
# Module wrapper
# ----------------------------------------------------------------------------

@functools.partial(jax.jit, static_argnames=("dim", "keep_dim"))
def _mean_forward(x, dim, keep_dim):
    ndim = x.ndim
    d = dim % ndim                      # PyTorch-style negative-dim handling
    shape = x.shape
    K = shape[d]
    pre = 1
    for s in shape[:d]:
        pre *= s
    post = 1
    for s in shape[d + 1:]:
        post *= s

    if post == 1:
        out = _mean_last_axis(x.reshape(pre, K))            # (pre, 1)
    else:
        out = _mean_middle_axis(x.reshape(pre, K, post))    # (pre, post)

    if keep_dim:
        out_shape = shape[:d] + (1,) + shape[d + 1:]
    else:
        out_shape = shape[:d] + shape[d + 1:]
    return out.reshape(out_shape)


class Mean:
    """JAX/Pallas equivalent of Segmentation/encoding/nn/customize.py::Mean."""

    def __init__(self, dim, keep_dim=False):
        self.dim = dim
        self.keep_dim = keep_dim

    def __call__(self, x):
        return _mean_forward(x, self.dim, self.keep_dim)


# ----------------------------------------------------------------------------
# Self-test
# ----------------------------------------------------------------------------

if __name__ == "__main__":
    key = jax.random.PRNGKey(0)
    keys = jax.random.split(key, 8)

    def check(x, dim, keep_dim, tol):
        out = jax.block_until_ready(Mean(dim, keep_dim=keep_dim)(x))
        ref = jnp.mean(x.astype(jnp.float32), axis=dim,
                       keepdims=keep_dim).astype(x.dtype)
        if out.shape != ref.shape:
            print(f"shape mismatch dim={dim} keep_dim={keep_dim}: "
                  f"{out.shape} vs {ref.shape}")
            return False
        if not jnp.allclose(out.astype(jnp.float32), ref.astype(jnp.float32),
                            atol=tol, rtol=tol):
            print(f"value mismatch dim={dim} keep_dim={keep_dim} "
                  f"dtype={x.dtype}")
            return False
        return True

    x = jax.random.normal(keys[0], (2, 4, 16, 16), dtype=jnp.float32)
    x_ragged = jax.random.normal(keys[1], (5, 7, 260), dtype=jnp.float32)    # M % 8 != 0
    x_bigk = jax.random.normal(keys[2], (40, 5000), dtype=jnp.float32)       # short-fat
    x_mid = jax.random.normal(keys[3], (3, 1000, 20), dtype=jnp.float32)     # mid-axis reduce
    x_bf16 = jax.random.normal(keys[4], (2, 4, 16, 16), dtype=jnp.bfloat16)  # MXU row-sum
    x_bf16_bigk = jax.random.normal(keys[5], (32, 5000), dtype=jnp.bfloat16)  # MXU + K tiling

    ok = True
    for dim, keep_dim in [(3, False), (2, True), (1, False), (-1, True), (0, False)]:
        ok &= check(x, dim, keep_dim, 1e-5)
    ok &= check(x_ragged, 2, False, 1e-5)
    ok &= check(x_bigk, 1, False, 1e-4)
    ok &= check(x_mid, 1, True, 1e-5)
    ok &= check(x_bf16, 3, False, 2e-2)
    ok &= check(x_bf16_bigk, 1, False, 2e-2)   # masked tail + megacore split (bf16)

    # Shrink the VMEM budget to force the K-tiled / masked-tail code paths of
    # both kernel variants at tiny shapes (new shapes -> fresh jit traces).
    _BUDGET_OVERRIDE = (256 * 1024, 8 * _MIB)
    x_force_last = jax.random.normal(keys[6], (48, 5001), dtype=jnp.float32)
    x_force_mid = jax.random.normal(keys[7], (3, 999, 20), dtype=jnp.float32)
    ok &= check(x_force_last, 1, False, 1e-4)
    ok &= check(x_force_mid, 1, True, 1e-4)
    _BUDGET_OVERRIDE = None

    if ok:
        print("KERNEL_OK")
</pallas_src>

<mosaic_0001>
module attributes {stable_mosaic.version = 11 : i64} {
  func.func @_mean_last_kernel(%arg0: i32, %arg1: i32, %arg2: memref<64x16xf32, #tpu.memory_space<vmem>>, %arg3: memref<64x1xf32, #tpu.memory_space<vmem>>, %arg4: memref<64x128xf32, #tpu.memory_space<vmem>>) attributes {dimension_semantics = [#tpu.dimension_semantics<parallel>, #tpu.dimension_semantics<arbitrary>], iteration_bounds = array<i64: 2, 1>, scalar_prefetch = 0 : i64, scratch_operands = 1 : i64, tpu.core_type = #tpu.core_type<tc>, window_params = [{transform_indices = @transform_0, window_bounds = array<i64: 64, 16>}, {transform_indices = @transform_1, window_bounds = array<i64: 64, 1>}]} {
    %c0_i32 = arith.constant 0 : i32
    %0 = arith.cmpi eq, %arg1, %c0_i32 : i32
    %1 = arith.extui %0 : i1 to i32
    %c0_i32_0 = arith.constant 0 : i32
    %2 = arith.cmpi ne, %1, %c0_i32_0 : i32
    scf.if %2 {
      %cst_8 = arith.constant 0.000000e+00 : f32
      %13 = vector.broadcast %cst_8 : f32 to vector<64x128xf32>
      %c0_9 = arith.constant 0 : index
      %c0_10 = arith.constant 0 : index
      %14 = vector.load %arg4[%c0_9, %c0_10] : memref<64x128xf32, #tpu.memory_space<vmem>>, vector<64x128xf32>
      tpu.vector_store %arg4[%c0_9, %c0_10], %13 {strides = array<i32>} : memref<64x128xf32, #tpu.memory_space<vmem>>, vector<64x128xf32>,
    } else {
    }
    %c0 = arith.constant 0 : index
    %c0_1 = arith.constant 0 : index
    %3 = vector.load %arg2[%c0, %c0_1] : memref<64x16xf32, #tpu.memory_space<vmem>>, vector<64x16xf32>
    %c0_2 = arith.constant 0 : index
    %c0_3 = arith.constant 0 : index
    %4 = vector.load %arg4[%c0_2, %c0_3] : memref<64x128xf32, #tpu.memory_space<vmem>>, vector<64x128xf32>
    %cst = arith.constant dense<0.000000e+00> : vector<64xf32>
    %5 = vector.multi_reduction <add>, %3, %cst [1] : vector<64x16xf32> to vector<64xf32>
    %6 = vector.shape_cast %5 : vector<64xf32> to vector<64x1xf32>
    %7 = vector.broadcast %6 : vector<64x1xf32> to vector<64x128xf32>
    %8 = arith.addf %4, %7 : vector<64x128xf32>
    %c0_4 = arith.constant 0 : index
    %c0_5 = arith.constant 0 : index
    %9 = vector.load %arg4[%c0_4, %c0_5] : memref<64x128xf32, #tpu.memory_space<vmem>>, vector<64x128xf32>
    tpu.vector_store %arg4[%c0_4, %c0_5], %8 {strides = array<i32>} : memref<64x128xf32, #tpu.memory_space<vmem>>, vector<64x128xf32>,
    %c0_i32_6 = arith.constant 0 : i32
    %10 = arith.cmpi eq, %arg1, %c0_i32_6 : i32
    %11 = arith.extui %10 : i1 to i32
    %c0_i32_7 = arith.constant 0 : i32
    %12 = arith.cmpi ne, %11, %c0_i32_7 : i32
    scf.if %12 {
      %c0_8 = arith.constant 0 : index
      %c0_9 = arith.constant 0 : index
      %13 = vector.load %arg4[%c0_8, %c0_9] : memref<64x128xf32, #tpu.memory_space<vmem>>, vector<64x128xf32>
      %14 = vector.extract_strided_slice %13 {offsets = [0, 0], sizes = [64, 1], strides = [1, 1]} : vector<64x128xf32> to vector<64x1xf32>
      %cst_10 = arith.constant 6.250000e-02 : f32
      %15 = vector.broadcast %cst_10 : f32 to vector<64x1xf32>
      %16 = arith.mulf %14, %15 : vector<64x1xf32>
      %c0_11 = arith.constant 0 : index
      %c0_12 = arith.constant 0 : index
      %17 = vector.load %arg3[%c0_11, %c0_12] : memref<64x1xf32, #tpu.memory_space<vmem>>, vector<64x1xf32>
      tpu.vector_store %arg3[%c0_11, %c0_12], %16 {strides = array<i32>} : memref<64x1xf32, #tpu.memory_space<vmem>>, vector<64x1xf32>,
    } else {
    }
    return
  }
  func.func @transform_0(%arg0: i32, %arg1: i32) -> (i32, i32) {
    %c0_i32 = arith.constant 0 : i32
    return %arg0, %arg1 : i32, i32
  }
  func.func @transform_1(%arg0: i32, %arg1: i32) -> (i32, i32) {
    %c0_i32 = arith.constant 0 : i32
    %c0_i32_0 = arith.constant 0 : i32
    return %arg0, %c0_i32 : i32, i32
  }
}

</mosaic_0001>

<bundles_post_ra>
// kernel: _mean_forward.1
= control target key start
LH: loop header
LB: loop body
LE: loop exit
PB: predicated region body
PF: predicated region fallthrough
CT: control target
= control target key end

     0   :  { %6 = vsyncpa [#allocation4], 0  ;;  %s604_s0 = inlined_call_operand.hbm [shape: f32[128,16], index: 0, kind: input, shape index: {}]   ;;  %s605_s1 = inlined_call_operand.vmem [shape: f32[128,1], index: 1, kind: output, shape index: {}]  }
   0x1   :  { %8 = vsyncpa [#allocation4 + $0x1], 0  ;;  %s493_s6 = smov 0   ;;  %s495_s7 = smov 0  }
   0x2   :  { %s497_s8 = smov 0   ;;  %s499_s9 = smov 0  }
   0x3   :  { %s501_s10 = smov 0   ;;  %s503_s11 = smov 0  }
   0x4 LB: > { %s329_s12 = sadd.s32 4294967295, %s478_s11   ;;  %s26_s13 = sadd.s32 1, %s474_s10  ;;  %s478_s11 = sphi %s503_s11, %s14_s11   ;;  %s474_s10 = sphi %s501_s10, %s613_s10   ;;  %s470_s9 = sphi %s499_s9, %s612_s9   ;;  %s466_s8 = sphi %s497_s8, %s611_s8   ;;  %s462_s7 = sphi %s495_s7, %s610_s7   ;;  %s458_s6 = sphi %s493_s6, %s609_s6  }
   0x5   : > { %p28_p0 = scmp.ge.s32.totalorder %s26_s13, 2  ;;  %s35_s14 = sadd.s32 1, %s466_s8 }
   0x6   : > { %p42_p1 = scmp.ne.s32.totalorder %s466_s8, %s462_s7  ;;  %p43_p2 = scmp.eq.s32.totalorder %s478_s11, 0 }
   0x7   : > { %s615_s13 = smov (%p28_p0, %s26_s13), 0  ;;  %p48_p4 = scmp.ne.s32.totalorder %s462_s7, %s458_s6 }
   0x8   : > { %p529_p3 = por %p43_p2, %p42_p1  ;;  %s30_s16 = ssub.s32 %s474_s10, %s615_s13 }
   0x9   : > { %p49_p5 = scmp.eq.s32.totalorder %s329_s12, 0  ;;  %p33_p6 = scmp.eq.s32.totalorder %s30_s16, 0 }
   0xa   : > { %p349_p8 = scmp.lt.s32.totalorder %s478_s11, 2  ;;  %s98_s19 = sand.u32 1, %s466_s8  }
   0xb   : > { %p536_p7 = por %p49_p5, %p48_p4  ;;  %s342_s20 = sshll.u32 %s474_s10, 10 }
   0xc   : > { %s542_s18 = scalar_select %p33_p6, %s466_s8, %s35_s14  }
   0xd   : > { %s333_s21 = sshll.u32 %s98_s19, 6  ;;  %s109_s24 = scalar_lea.hbm %s604_s0, %s342_s20 }
   0xe   : > { %s102_s25 = scalar_lea.vmem [#allocation3], %s333_s21  ;;  %p551_p9 = pnand %p349_p8, %p529_p3 }
   0xf   : > { %s110_s26 = sshll.u32 %s102_s25, 4  ;;  %s99_s28 = scalar_lea.sflag [#allocation4], %s98_s19  ;;  %s111_s26 = int_to_ptr.vmem [resolvable:$true] %s110_s26 }
  0x10   : > { %p402_p10 = pneg %p551_p9  ;;  %s413_s29 = scalar_lea.vmem %s111_s26, 1024 }
  0x11   : > { %p414_p11 = scmp.ne.s32.totalorder %s111_s26, %s413_s29  ;;  %s480_s30 = smov [#allocation3]  }
  0x12   : > { %s418_s2 = sshll.u32 %s480_s30, 4  ;;  %s419_s2 = int_to_ptr.vmem [resolvable:$false] %s418_s2 }
  0x13   : > { %p416_p12 = pnand %p414_p11, %p402_p10  ;;  %s420_s3 = scalar_lea.vmem %s419_s2, 2048 }
  0x14   : > { %p421_p0 = scmp.lt.s32.totalorder %s111_s26, %s419_s2  ;;  %p422_p1 = scmp.lt.s32.totalorder %s420_s3, %s413_s29 }
  0x15   : > { %p417_p13 = pneg %p416_p12 }
  0x16   : > { %p423_p2 = por %p422_p1, %p421_p0 }
  0x18   : > { %p424_p3 = pnand %p423_p2, %p417_p13 }
  0x1a   : > { %427 = shalt.err (!%p424_p3)
}
  0x1b   : > { %s481_s4 = smov 128   ;;  %s482_s5 = smov 8  }
  0x1c   : > { %348 = dma.hbm_to_vmem [thread:$0]  (!%p551_p9), %s109_s24, 1024, %s111_s26, %s99_s28, %s481_s4, %s481_s4, %s482_s5  }
  0x1d   : > { %p336_p4 = scmp.ge.s32.totalorder %s478_s11, 1  ;;  %p118_p5 = scmp.lt.s32.totalorder %s478_s11, 3 }
  0x1f   : > { %p119_p6 = pnand %p336_p4, %p118_p5 }
  0x20   : > { %s124_s6 = sand.u32 (!%p119_p6), 1, %s462_s7  }
  0x21   : > { %122 = sbr.rel (%p119_p6) target bundleno = 194 (0xc2), region = 24  ;;  %s337_s12 = sshll.u32 (!%p119_p6), %s124_s6, 6 }
  0x22   : > { %s125_s14 = scalar_lea.sflag (!%p119_p6), [#allocation4], %s124_s6  ;;  %s128_s15 = scalar_lea.vmem (!%p119_p6), [#allocation3], %s337_s12 }
  0x26   : > { %453 = dma.done.wait (%p536_p7), %s125_s14, 1024  }
  0x27   : > { %455 = vsyncadd (%p536_p7), %s125_s14, 4294966272  ;;  %vm182_vm0 = vcmask 130048   ;;  %v168_v0 = vld [vmem:[%s128_s15 + $0x10] sm:$0xff]  ;;  %v166_v1 = vld [vmem:[%s128_s15] sm:$0xff]  ;;  %s338_s16 = sshll.u32 %s470_s9, 3  ;;  %vm242_vm1 = vcmask 7168  }
  0x28   : > { %v169_v2 = vld [vmem:[%s128_s15 + $0x18] sm:$0xff]  ;;  %v189_v3 = vsel %vm182_vm0, %v168_v0, 0.0  ;;  %v183_v4 = vsel %vm182_vm0, %v166_v1, 0.0  ;;  %v167_v5 = vld [vmem:[%s128_s15 + $0x8] sm:$0xff]  ;;  %v170_v9 = vld [vmem:[%s128_s15 + $0x20] sm:$0xff]  ;;  %p149_p7 = scmp.lt.s32.totalorder %s338_s16, 15 }
  0x29   : > { %190 = vadd.xlane.f32.xlu1 %v189_v3  ;;  %184 = vadd.xlane.f32.xlu0 %v183_v4  ;;  %v192_v6 = vsel %vm182_vm0, %v169_v2, 0.0  ;;  %v186_v7 = vsel %vm182_vm0, %v167_v5, 0.0  ;;  %v171_v8 = vld [vmem:[%s128_s15 + $0x28] sm:$0xff]  ;;  %v195_v11 = vsel %vm182_vm0, %v170_v9, 0.0  ;;  %v173_v12 = vld [vmem:[%s128_s15 + $0x38] sm:$0xff]  ;;  %v172_v13 = vld [vmem:[%s128_s15 + $0x30] sm:$0xff] }
  0x2a   : > { %v198_v10 = vsel %vm182_vm0, %v171_v8, 0.0  ;;  %v204_v14 = vsel %vm182_vm0, %v173_v12, 0.0  ;;  %v201_v15 = vsel %vm182_vm0, %v172_v13, 0.0  ;;  %s617_s16 = smov (!%p149_p7, %s338_s16), 15 }
  0x2b   : > { %s339_s17 = sshll.u32 %s617_s16, 3 }
  0x2c   : > { %s152_s21 = scalar_lea.vmem %s605_s1, %s339_s17 }
  0x2d   : > { %193 = vadd.xlane.f32.xlu1 %v192_v6  ;;  %187 = vadd.xlane.f32.xlu0 %v186_v7 }
  0x31   : > { %199 = vadd.xlane.f32.xlu1 %v198_v10  ;;  %196 = vadd.xlane.f32.xlu0 %v195_v11 }
  0x35   : > { %205 = vadd.xlane.f32.xlu1 %v204_v14  ;;  %202 = vadd.xlane.f32.xlu0 %v201_v15 }
  0xb2   : > { %v191_v16 = vpop.xlane.xlu1 %190  ;;  %v185_v17 = vpop.xlane.xlu0 %184 }
  0xb3   : > { %v236_v18 = vmul.f32 0.0625, %v191_v16  ;;  %v234_v19 = vmul.f32 0.0625, %v185_v17 }
  0xb5   : > { %245 = vst.msk [vmem:[%s152_s21 + $0x10] sm:$0xff] %vm242_vm1, %v236_v18  ;;  %243 = vst.msk [vmem:[%s152_s21] sm:$0xff] %vm242_vm1, %v234_v19 }
  0xb6   : > { %v194_v20 = vpop.xlane.xlu1 %193  ;;  %v188_v21 = vpop.xlane.xlu0 %187 }
  0xb7   : > { %v237_v22 = vmul.f32 0.0625, %v194_v20  ;;  %v235_v23 = vmul.f32 0.0625, %v188_v21 }
  0xb9   : > { %246 = vst.msk [vmem:[%s152_s21 + $0x18] sm:$0xff] %vm242_vm1, %v237_v22  ;;  %244 = vst.msk [vmem:[%s152_s21 + $0x8] sm:$0xff] %vm242_vm1, %v235_v23 }
  0xba   : > { %v200_v24 = vpop.xlane.xlu1 %199  ;;  %v197_v25 = vpop.xlane.xlu0 %196 }
  0xbb   : > { %v239_v26 = vmul.f32 0.0625, %v200_v24  ;;  %v238_v27 = vmul.f32 0.0625, %v197_v25 }
  0xbd   : > { %248 = vst.msk [vmem:[%s152_s21 + $0x28] sm:$0xff] %vm242_vm1, %v239_v26  ;;  %247 = vst.msk [vmem:[%s152_s21 + $0x20] sm:$0xff] %vm242_vm1, %v238_v27 }
  0xbe   : > { %v206_v28 = vpop.xlane.xlu1 %205  ;;  %v203_v29 = vpop.xlane.xlu0 %202 }
  0xbf   : > { %v241_v30 = vmul.f32 0.0625, %v206_v28  ;;  %v240_v31 = vmul.f32 0.0625, %v203_v29 }
  0xc1   : > { %250 = vst.msk [vmem:[%s152_s21 + $0x38] sm:$0xff] %vm242_vm1, %v241_v30  ;;  %249 = vst.msk [vmem:[%s152_s21 + $0x30] sm:$0xff] %vm242_vm1, %v240_v31 }
  0xc2 PF: > { %s14_s11 = sadd.s32 1, %s478_s11   ;;  %s609_s6 = smov %s462_s7 }
  0xc3   : > { %p11_p8 = scmp.ge.s32.totalorder %s14_s11, 4   ;;  %s610_s7 = smov %s466_s8 }
  0xc4   : > { %s611_s8 = smov %s542_s18  ;;  %s612_s9 = smov %s474_s10 }
  0xc5   : > { %s613_s10 = smov %s615_s13  ;;  %13 = sbr.rel (!%p11_p8) target bundleno = 4 (0x4), region = 72 }
  0xca   :  { %273 = vsyncpa [#allocation4], 1 }
  0xcb   :  { %275 = vsyncpa [#allocation4 + $0x1], 1 }

</bundles_post_ra>
